<compile_context>
chip_gen: v7x
topology: tpu7x:2x2x1
jax: 0.10.0
libtpu: 0.0.40
codegen_flags: <defaults>
</compile_context>

<pallas_src>
import jax
import jax.numpy as jnp
from jax.experimental import pallas as pl
from jax.experimental.pallas import tpu as pltpu


# ---------------------------------------------------------------------------
# Kernel
# ---------------------------------------------------------------------------
def _kl_inverse_kernel(q_ref, p_ref, acc_ref):
    """Accumulate per-lane partial sums of q * (log2(q) - log2(p))."""
    # Resident (8, C) accumulator per core: same output block across the
    # reduction ("arbitrary") axis.
    @pl.when(pl.program_id(1) == 0)
    def _():
        acc_ref[...] = jnp.zeros_like(acc_ref)

    # Upcast in-kernel (no-op for f32; keeps bf16 inputs at half the HBM bytes
    # while evaluating log2 in f32).
    q = q_ref[...].astype(jnp.float32)
    p = p_ref[...].astype(jnp.float32)

    # Two clean log2 pushes instead of a full-precision divide + log (EUP-
    # friendly at v7x bandwidth; numerically equivalent for this loss).
    contrib = q * (jnp.log2(q) - jnp.log2(p))

    # Fold tb rows down to 8 sublane rows with plain VPU adds (no cross-
    # sublane XLU reduce inside the kernel).
    tb = contrib.shape[0]
    acc_ref[...] += contrib.reshape(tb // 8, 8, contrib.shape[1]).sum(axis=0)


# ---------------------------------------------------------------------------
# Tiling helpers
# ---------------------------------------------------------------------------
def _cdiv(a, b):
    return (a + b - 1) // b


def _round_up(x, m):
    return _cdiv(x, m) * m


def _pick_tile_rows(n_rows, lane_width, itemsize, num_splits, budget_bytes):
    """Rows per tile from a per-buffer byte budget, dtype-aware granularity."""
    gran = max(8, 32 // itemsize)  # f32 -> 8, bf16 -> 16, int8/fp8 -> 32
    tb = max(gran, (budget_bytes // (lane_width * itemsize)) // gran * gran)
    # Never larger than one core's (rounded-up) share of the rows.
    per_core = _round_up(_cdiv(n_rows, num_splits), gran)
    return min(tb, per_core)


# ---------------------------------------------------------------------------
# Wrapper
# ---------------------------------------------------------------------------
def kl_inverse(q_pred, p_targ, *, num_splits=2, per_buffer_bytes=1 << 20):
    """loss = mean_b( sum_d( Q[b,d] * log2(Q[b,d] / P[b,d]) ) ).

    q_pred, p_targ: [B, D] strictly-positive distributions over dim 1
    (f32 or bf16).  Returns a scalar float32 loss.
    """
    assert q_pred.shape == p_targ.shape and q_pred.ndim == 2
    B, D = q_pred.shape
    N = B * D
    itemsize = jnp.dtype(q_pred.dtype).itemsize

    # Lane-dense slab width (multiple of 128); narrower for tiny problems to
    # limit padding, wider (4 vregs) once there is real data to stream.
    C = 512 if N >= 512 * 64 else 128

    n_rows = _cdiv(N, C)
    tb = _pick_tile_rows(n_rows, C, itemsize, num_splits, per_buffer_bytes)
    steps = _cdiv(n_rows, num_splits * tb)
    rows_padded = num_splits * steps * tb
    n_padded = rows_padded * C

    q_flat = q_pred.reshape(-1)
    p_flat = p_targ.reshape(-1)
    pad = n_padded - N
    if pad:
        # q = p = 1  ->  1 * log2(1) == 0 exact contribution from padding.
        q_flat = jnp.concatenate([q_flat, jnp.ones((pad,), q_flat.dtype)])
        p_flat = jnp.concatenate([p_flat, jnp.ones((pad,), p_flat.dtype)])
    q2 = q_flat.reshape(rows_padded, C)
    p2 = p_flat.reshape(rows_padded, C)

    # Each core c owns a contiguous band of `steps` tiles.
    in_tile = lambda: pl.BlockSpec((tb, C), lambda c, i: (c * steps + i, 0))

    partial = pl.pallas_call(
        _kl_inverse_kernel,
        out_shape=jax.ShapeDtypeStruct((num_splits * 8, C), jnp.float32),
        grid=(num_splits, steps),
        in_specs=[in_tile(), in_tile()],
        # Per-core resident accumulator block: index depends only on the
        # parallel axis, constant across the reduction axis.
        out_specs=pl.BlockSpec((8, C), lambda c, i: (c, 0)),
        compiler_params=pltpu.CompilerParams(
            dimension_semantics=("parallel", "arbitrary"),
            # Tiles are byte-budgeted (~4-6 MiB total); explicit limit keeps
            # headroom on every generation (<= v7x's 64 MiB physical VMEM).
            vmem_limit_bytes=48 * 1024 * 1024,
        ),
    )(q2, p2)

    # Tiny epilogue in plain JAX: cross-lane/row reduce of (num_splits*8, C)
    # partials, then the batch mean.
    return jnp.sum(partial) * (1.0 / B)


# ---------------------------------------------------------------------------
# Main
# ---------------------------------------------------------------------------
if __name__ == "__main__":
    key = jax.random.PRNGKey(0)

    def _check(B, D, k):
        kq, kp = jax.random.split(k)
        # Q_pred / P_targ are probability distributions over dim=1 (all > 0).
        q_pred = jax.nn.softmax(jax.random.normal(kq, (B, D), jnp.float32), -1)
        p_targ = jax.nn.softmax(jax.random.normal(kp, (B, D), jnp.float32), -1)

        loss = jax.block_until_ready(kl_inverse(q_pred, p_targ))

        # Reference in plain JAX, mirroring the torch forward exactly.
        ref = jnp.mean(jnp.sum(q_pred * jnp.log2(q_pred / p_targ), axis=1))
        ref = jax.block_until_ready(ref)
        assert jnp.allclose(loss, ref, atol=1e-5, rtol=1e-4), (B, D, loss, ref)

    k1, k2 = jax.random.split(key)
    _check(32, 48, k1)   # D not a multiple of 128 -> exercises lane-dense flatten
    _check(7, 300, k2)   # awkward B and D -> exercises tail padding path

    print("KERNEL_OK")
</pallas_src>

<mosaic_0001>
module attributes {stable_mosaic.version = 11 : i64} {
  func.func @_kl_inverse_kernel(%arg0: i32, %arg1: i32, %arg2: memref<8x128xf32, #tpu.memory_space<vmem>>, %arg3: memref<8x128xf32, #tpu.memory_space<vmem>>, %arg4: memref<8x128xf32, #tpu.memory_space<vmem>>) attributes {dimension_semantics = [#tpu.dimension_semantics<parallel>, #tpu.dimension_semantics<arbitrary>], iteration_bounds = array<i64: 2, 1>, scalar_prefetch = 0 : i64, scratch_operands = 0 : i64, tpu.core_type = #tpu.core_type<tc>, window_params = [{transform_indices = @transform_0, window_bounds = array<i64: 8, 128>}, {transform_indices = @transform_1, window_bounds = array<i64: 8, 128>}, {transform_indices = @transform_2, window_bounds = array<i64: 8, 128>}]} {
    %c0_i32 = arith.constant 0 : i32
    %0 = arith.cmpi eq, %arg1, %c0_i32 : i32
    %1 = arith.extui %0 : i1 to i32
    %c0_i32_0 = arith.constant 0 : i32
    %2 = arith.cmpi ne, %1, %c0_i32_0 : i32
    scf.if %2 {
      %cst_10 = arith.constant 0.000000e+00 : f32
      %20 = vector.broadcast %cst_10 : f32 to vector<8x128xf32>
      %c0_11 = arith.constant 0 : index
      %c0_12 = arith.constant 0 : index
      %21 = vector.load %arg4[%c0_11, %c0_12] : memref<8x128xf32, #tpu.memory_space<vmem>>, vector<8x128xf32>
      tpu.vector_store %arg4[%c0_11, %c0_12], %20 {strides = array<i32>} : memref<8x128xf32, #tpu.memory_space<vmem>>, vector<8x128xf32>,
    } else {
    }
    %c0 = arith.constant 0 : index
    %c0_1 = arith.constant 0 : index
    %3 = vector.load %arg2[%c0, %c0_1] : memref<8x128xf32, #tpu.memory_space<vmem>>, vector<8x128xf32>
    %c0_2 = arith.constant 0 : index
    %c0_3 = arith.constant 0 : index
    %4 = vector.load %arg3[%c0_2, %c0_3] : memref<8x128xf32, #tpu.memory_space<vmem>>, vector<8x128xf32>
    %5 = math.log %3 : vector<8x128xf32>
    %cst = arith.constant 2.000000e+00 : f32
    %6 = math.log %cst : f32
    %7 = vector.broadcast %6 : f32 to vector<8x128xf32>
    %8 = arith.divf %5, %7 : vector<8x128xf32>
    %9 = math.log %4 : vector<8x128xf32>
    %cst_4 = arith.constant 2.000000e+00 : f32
    %10 = math.log %cst_4 : f32
    %11 = vector.broadcast %10 : f32 to vector<8x128xf32>
    %12 = arith.divf %9, %11 : vector<8x128xf32>
    %13 = arith.subf %8, %12 : vector<8x128xf32>
    %14 = arith.mulf %3, %13 : vector<8x128xf32>
    %c0_5 = arith.constant 0 : index
    %c0_6 = arith.constant 0 : index
    %15 = vector.load %arg4[%c0_5, %c0_6] : memref<8x128xf32, #tpu.memory_space<vmem>>, vector<8x128xf32>
    %16 = vector.shape_cast %14 : vector<8x128xf32> to vector<1x8x128xf32>
    %cst_7 = arith.constant dense<0.000000e+00> : vector<8x128xf32>
    %17 = vector.multi_reduction <add>, %16, %cst_7 [0] : vector<1x8x128xf32> to vector<8x128xf32>
    %18 = arith.addf %15, %17 : vector<8x128xf32>
    %c0_8 = arith.constant 0 : index
    %c0_9 = arith.constant 0 : index
    %19 = vector.load %arg4[%c0_8, %c0_9] : memref<8x128xf32, #tpu.memory_space<vmem>>, vector<8x128xf32>
    tpu.vector_store %arg4[%c0_8, %c0_9], %18 {strides = array<i32>} : memref<8x128xf32, #tpu.memory_space<vmem>>, vector<8x128xf32>,
    return
  }
  func.func @transform_0(%arg0: i32, %arg1: i32) -> (i32, i32) {
    %c1_i32 = arith.constant 1 : i32
    %0 = arith.muli %arg0, %c1_i32 : i32
    %1 = arith.addi %0, %arg1 : i32
    %c0_i32 = arith.constant 0 : i32
    %c0_i32_0 = arith.constant 0 : i32
    return %1, %c0_i32 : i32, i32
  }
  func.func @transform_1(%arg0: i32, %arg1: i32) -> (i32, i32) {
    %c1_i32 = arith.constant 1 : i32
    %0 = arith.muli %arg0, %c1_i32 : i32
    %1 = arith.addi %0, %arg1 : i32
    %c0_i32 = arith.constant 0 : i32
    %c0_i32_0 = arith.constant 0 : i32
    return %1, %c0_i32 : i32, i32
  }
  func.func @transform_2(%arg0: i32, %arg1: i32) -> (i32, i32) {
    %c0_i32 = arith.constant 0 : i32
    %c0_i32_0 = arith.constant 0 : i32
    return %arg0, %c0_i32 : i32, i32
  }
}

</mosaic_0001>

<bundles_post_ra>
// kernel: tpu_custom_call.1
= control target key start
LH: loop header
LB: loop body
LE: loop exit
PB: predicated region body
PF: predicated region fallthrough
CT: control target
= control target key end

     0   :  { %7 = vsyncpa [#allocation3], 0  ;;  %s827_s0 = inlined_call_operand.hbm [shape: f32[16,128], index: 0, kind: input, shape index: {}]   ;;  %s828_s1 = inlined_call_operand.hbm [shape: f32[16,128], index: 1, kind: input, shape index: {}]   ;;  %s829_s2 = inlined_call_operand.hbm [shape: f32[16,128], index: 2, kind: output, shape index: {}]  }
   0x1   :  { %9 = vsyncpa [#allocation3 + $0x1], 0 }
   0x2   :  { %10 = vsyncpa [#allocation6], 0 }
   0x3   :  { %12 = vsyncpa [#allocation6 + $0x1], 0 }
   0x4   :  { %13 = vsyncpa [#allocation4], 0 }
   0x5   :  { %15 = vsyncpa [#allocation4 + $0x1], 0  ;;  %s607_s9 = smov 0   ;;  %s609_s10 = smov 0  }
   0x6   :  { %s611_s11 = smov 0   ;;  %s613_s12 = smov 0  }
   0x7   :  { %s615_s13 = smov 0   ;;  %s617_s14 = smov 0  }
   0x8 LB: > { %s353_s15 = sadd.s32 4294967295, %s587_s14   ;;  %s354_s16 = sadd.s32 4294967294, %s587_s14   ;;  %s587_s14 = sphi %s617_s14, %s21_s14   ;;  %s583_s13 = sphi %s615_s13, %s849_s13   ;;  %s579_s12 = sphi %s613_s12, %s848_s12   ;;  %s575_s11 = sphi %s611_s11, %s847_s11   ;;  %s571_s10 = sphi %s609_s10, %s846_s10   ;;  %s567_s9 = sphi %s607_s9, %s845_s9  }
   0x9   : > { %s33_s17 = sadd.s32 1, %s583_s13  ;;  %s42_s18 = sadd.s32 1, %s575_s11 }
   0xa   : > { %p35_p0 = scmp.ge.s32.totalorder %s33_s17, 2  ;;  %p49_p1 = scmp.ne.s32.totalorder %s575_s11, %s571_s10 }
   0xb   : > { %p50_p2 = scmp.eq.s32.totalorder %s587_s14, 0  ;;  %p55_p3 = scmp.ne.s32.totalorder %s571_s10, %s567_s9 }
   0xc   : > { %s851_s17 = smov (%p35_p0, %s33_s17), 0  ;;  %p56_p5 = scmp.eq.s32.totalorder %s353_s15, 0 }
   0xd   : > { %p648_p4 = por %p50_p2, %p49_p1  ;;  %s39_s20 = ssub.s32 %s583_s13, %s851_s17 }
   0xe   : > { %p107_p6 = scmp.eq.s32.totalorder %s353_s15, 1  ;;  %p40_p7 = scmp.eq.s32.totalorder %s39_s20, 0 }
   0xf   : > { %p654_p8 = por %p56_p5, %p55_p3  ;;  %p113_p10 = scmp.eq.s32.totalorder %s354_s16, 1 }
  0x10   : > { %p658_p9 = por %p107_p6, %p49_p1  ;;  %p386_p13 = scmp.lt.s32.totalorder %s587_s14, 2 }
  0x11   : > { %s833_s21 = scalar_select %p654_p8, 1, 0 }
  0x12   : > { %s834_s22 = scalar_select %p658_p9, 1, 0 }
  0x13   : > { %s663_s23 = scalar_select %p40_p7, %s575_s11, %s42_s18  }
  0x14   : > { %p665_p11 = por %p113_p10, %p55_p3  ;;  %s672_s25 = sand.u32 1, %s575_s11  }
  0x15   : > { %s357_s26 = sshll.u32 %s672_s25, 3  ;;  %s358_s27 = sshll.u32 %s583_s13, 7 }
  0x16   : > { %s835_s24 = scalar_select %p665_p11, 1, 0 }
  0x17   : > { %s681_s30 = scalar_lea.hbm %s827_s0, %s358_s27  ;;  %s137_s3 = scalar_lea.vmem [#allocation2], %s357_s26 }
  0x18   : > { %s145_s4 = sshll.u32 %s137_s3, 4  ;;  %p689_p0 = pnand %p386_p13, %p648_p4  ;;  %s685_s4 = int_to_ptr.vmem [resolvable:$true] %s145_s4 }
  0x19   : > { %s134_s6 = scalar_lea.sflag [#allocation3], %s672_s25  ;;  %s441_s7 = scalar_lea.hbm %s681_s30, 128 }
  0x1a   : > { %p442_p3 = scmp.ne.s32.totalorder %s681_s30, %s441_s7  ;;  %p443_p5 = pneg %p689_p0 }
  0x1b   : > { %s446_s16 = scalar_lea.hbm %s827_s0, 256  ;;  %p447_p4 = scmp.lt.u32.totalorder %s681_s30, %s827_s0 }
  0x1c   : > { %p444_p6 = pnand %p443_p5, %p442_p3  ;;  %p448_p10 = scmp.lt.u32.totalorder %s446_s16, %s441_s7 }
  0x1d   : > { %p450_p12 = scmp.lt.u32.totalorder %s441_s7, %s681_s30 }
  0x1e   : > { %p445_p7 = pneg %p444_p6  ;;  %p449_p13 = por %p448_p10, %p447_p4 }
  0x20   : > { %p451_p1 = por %p450_p12, %p449_p13 }
  0x22   : > { %p452_p2 = pnand %p451_p1, %p445_p7 }
  0x24   : > { %455 = shalt.err (!%p452_p2)
}
  0x25   : > { %s456_s20 = scalar_lea.vmem %s685_s4, 128  ;;  %s589_s28 = smov [#allocation2]  }
  0x26   : > { %p457_p3 = scmp.ne.s32.totalorder %s685_s4, %s456_s20  ;;  %s461_s29 = sshll.u32 %s589_s28, 4  ;;  %s462_s29 = int_to_ptr.vmem [resolvable:$false] %s461_s29 }
  0x27   : > { %s463_s3 = scalar_lea.vmem %s462_s29, 256  ;;  %p464_p9 = scmp.lt.s32.totalorder %s685_s4, %s462_s29 }
  0x28   : > { %p459_p6 = pnand %p457_p3, %p443_p5  ;;  %p465_p4 = scmp.lt.s32.totalorder %s463_s3, %s456_s20 }
  0x2a   : > { %p460_p11 = pneg %p459_p6  ;;  %p466_p10 = por %p465_p4, %p464_p9 }
  0x2c   : > { %p467_p12 = pnand %p466_p10, %p460_p11 }
  0x2e   : > { %470 = shalt.err (!%p467_p12)
}
  0x2f   : > { %378 = dma.hbm_to_vmem [thread:$0]  (!%p689_p0), %s681_s30, 128, %s685_s4, %s134_s6  }
  0x30   : > { %p837_p1 = scmp.lt.s32.totalorder %s587_s14, 3  ;;  %p838_p2 = scmp.ge.s32.totalorder %s587_s14, 1 }
  0x31   : > { %s734_s16 = scalar_lea.hbm %s828_s1, %s358_s27  ;;  %s156_s18 = scalar_lea.vmem [#allocation5], %s357_s26 }
  0x32   : > { %p725_p7 = pnand %p838_p2, %p837_p1  ;;  %s164_s19 = sshll.u32 %s156_s18, 4  ;;  %s165_s19 = int_to_ptr.vmem [resolvable:$true] %s164_s19 }
  0x33   : > { %s153_s30 = scalar_lea.sflag [#allocation6], %s672_s25  ;;  %s471_s4 = scalar_lea.hbm %s734_s16, 128 }
  0x34   : > { %s839_s7 = scalar_select %p725_p7, 1, 0 }
  0x35   : > { %p472_p9 = scmp.ne.s32.totalorder %s734_s16, %s471_s4  ;;  %s476_s27 = scalar_lea.hbm %s828_s1, 256 }
  0x36   : > { %p477_p3 = scmp.lt.u32.totalorder %s734_s16, %s828_s1  ;;  %p478_p6 = scmp.lt.u32.totalorder %s476_s27, %s471_s4 }
  0x37   : > { %p474_p11 = pnand %p472_p9, %p443_p5  ;;  %p480_p10 = scmp.lt.u32.totalorder %s471_s4, %s734_s16 }
  0x38   : > { %p479_p4 = por %p478_p6, %p477_p3 }
  0x39   : > { %p475_p13 = pneg %p474_p11 }
  0x3a   : > { %p481_p12 = por %p480_p10, %p479_p4 }
  0x3c   : > { %p482_p1 = pnand %p481_p12, %p475_p13 }
  0x3e   : > { %485 = shalt.err (!%p482_p1)
}
  0x3f   : > { %s486_s25 = scalar_lea.vmem %s165_s19, 128  ;;  %s590_s26 = smov [#allocation5]  }
  0x40   : > { %p487_p2 = scmp.ne.s32.totalorder %s165_s19, %s486_s25  ;;  %s491_s3 = sshll.u32 %s590_s26, 4  ;;  %s492_s3 = int_to_ptr.vmem [resolvable:$false] %s491_s3 }
  0x41   : > { %s493_s8 = scalar_lea.vmem %s492_s3, 256  ;;  %p494_p8 = scmp.lt.s32.totalorder %s165_s19, %s492_s3 }
  0x42   : > { %p489_p9 = pnand %p487_p2, %p443_p5  ;;  %p495_p7 = scmp.lt.s32.totalorder %s493_s8, %s486_s25 }
  0x44   : > { %p490_p11 = pneg %p489_p9  ;;  %p496_p3 = por %p495_p7, %p494_p8 }
  0x46   : > { %p497_p6 = pnand %p496_p3, %p490_p11 }
  0x48   : > { %500 = shalt.err (!%p497_p6)
}
  0x49   : > { %381 = dma.hbm_to_vmem [thread:$0]  (!%p689_p0), %s734_s16, 128, %s165_s19, %s153_s30  }
  0x4a   : > { %p840_p13 = scmp.ne.s32.totalorder %s839_s7, 0 }
  0x4b   : > { %s761_s15 = sand.u32 (!%p840_p13), 1, %s571_s10   ;;  %p841_p5 = scmp.ne.s32.totalorder (!%p840_p13), %s833_s21, 0 }
  0x4c   : > { %173 = sbr.rel (%p840_p13) target bundleno = 121 (0x79), region = 28  ;;  %s362_s18 = sshll.u32 (!%p840_p13), %s761_s15, 3 }
  0x4d   : > { %s176_s4 = scalar_lea.sflag (!%p840_p13), [#allocation3], %s761_s15  ;;  %s179_s6 = scalar_lea.vmem (!%p840_p13), [#allocation2], %s362_s18 }
  0x53   : > { %554 = dma.done.wait (%p841_p5), %s176_s4, 128  }
  0x54   : > { %556 = vsyncadd (%p841_p5), %s176_s4, 4294967168  ;;  %s185_s5 = scalar_lea.sflag [#allocation6], %s761_s15  ;;  %s188_s16 = scalar_lea.vmem [#allocation5], %s362_s18 }
  0x55   : > { %558 = dma.done.wait (%p841_p5), %s185_s5, 128  }
  0x56   : > { %560 = vsyncadd (%p841_p5), %s185_s5, 4294967168  ;;  %v221_v0 = vld [vmem:[%s179_s6] sm:$0xff]  ;;  %v222_v1 = vld [vmem:[%s188_s16] sm:$0xff]  ;;  %s366_s7 = sshll.u32 %s579_s12, 7  ;;  %s213_s19 = scalar_lea.vmem [#allocation7], %s362_s18 }
  0x57   : > { %437 = vlog2.f32 %v221_v0  ;;  %s250_s30 = sshll.u32 %s213_s19, 4  ;;  %s778_s27 = scalar_lea.hbm %s829_s2, %s366_s7  ;;  %s780_s30 = int_to_ptr.vmem [resolvable:$true] %s250_s30 }
  0x58   : > { %439 = vlog2.f32 %v222_v1  ;;  %s237_s28 = scalar_lea.sflag [#allocation4], %s761_s15  ;;  %s501_s29 = scalar_lea.vmem %s780_s30, 128 }
  0x59   : > { %p502_p8 = scmp.ne.s32.totalorder %s780_s30, %s501_s29  ;;  %p842_p0 = scmp.ne.s32.totalorder %s834_s22, 0 }
  0x5a   : > { %s591_s12 = smov [#allocation7]  }
  0x5b   : > { %p503_p7 = pnand %p502_p8, %p842_p0  ;;  %s505_s25 = sshll.u32 %s591_s12, 4  ;;  %s506_s25 = int_to_ptr.vmem [resolvable:$false] %s505_s25 }
  0x5c   : > { %s507_s26 = scalar_lea.vmem %s506_s25, 256  ;;  %p508_p10 = scmp.lt.s32.totalorder %s780_s30, %s506_s25 }
  0x5d   : > { %p504_p4 = pneg %p503_p7  ;;  %p509_p12 = scmp.lt.s32.totalorder %s507_s26, %s501_s29 }
  0x5f   : > { %p510_p1 = por %p509_p12, %p508_p10 }
  0x61   : > { %v438_v2 = vpop.eup %437  ;;  %p511_p2 = pnand %p510_p1, %p504_p4 }
  0x62   : > { %v440_v3 = vpop.eup %439  ;;  %v224_v4 = vmul.f32 0.6931472, %v438_v2 }
  0x63   : > { %v228_v5 = vmul.f32 0.6931472, %v440_v3 }
  0x64   : > { %v226_v6 = vmul.f32 1.442695, %v224_v4 }
  0x65   : > { %v229_v7 = vmul.f32 1.442695, %v228_v5 }
  0x67   : > { %v230_v8 = vsub.f32 %v226_v6, %v229_v7 }
  0x69   : > { %v231_v9 = vmul.f32 %v230_v8, %v221_v0 }
  0x6b   : > { %235 = vst [vmem:[%s213_s19] sm:$0xff] %v231_v9 }
  0x6c   : > { %514 = shalt.err (!%p511_p2)
}
  0x6d   : > { %s515_s3 = scalar_lea.hbm %s778_s27, 128  ;;  %s519_s18 = scalar_lea.hbm %s829_s2, 256 }
  0x6e   : > { %p516_p9 = scmp.ne.s32.totalorder %s778_s27, %s515_s3  ;;  %p520_p6 = scmp.lt.u32.totalorder %s778_s27, %s829_s2 }
  0x6f   : > { %p521_p13 = scmp.lt.u32.totalorder %s519_s18, %s515_s3  ;;  %p523_p8 = scmp.lt.u32.totalorder %s515_s3, %s778_s27 }
  0x70   : > { %p517_p11 = pnand %p516_p9, %p842_p0 }
  0x71   : > { %p522_p5 = por %p521_p13, %p520_p6 }
  0x72   : > { %p518_p3 = pneg %p517_p11 }
  0x73   : > { %p524_p7 = por %p523_p8, %p522_p5 }
  0x75   : > { %p525_p4 = pnand %p524_p7, %p518_p3 }
  0x77   : > { %528 = shalt.err (!%p525_p4)
}
  0x78   : > { %373 = dma.vmem_to_hbm [thread:$0]  (%p842_p0), %s780_s30, 128, %s778_s27, %s237_s28  }
  0x79 PF: > { %s262_s5 = sand.u32 1, %s567_s9   ;;  %p843_p10 = scmp.ne.s32.totalorder %s835_s24, 0 }
  0x7a   : > { %p844_p12 = scmp.ge.s32.totalorder %s587_s14, 2  ;;  %s263_s16 = scalar_lea.sflag [#allocation4], %s262_s5 }
  0x7c   : > { %p383_p1 = pnand %p844_p12, %p843_p10 }
  0x7e   : > { %562 = dma.done.wait (!%p383_p1), %s263_s16, 128  }
  0x7f   : > { %564 = vsyncadd (!%p383_p1), %s263_s16, 4294967168  ;;  %s21_s14 = sadd.s32 1, %s587_s14   ;;  %s845_s9 = smov %s571_s10 }
  0x80   : > { %p18_p2 = scmp.ge.s32.totalorder %s21_s14, 4   ;;  %s846_s10 = smov %s575_s11 }
  0x81   : > { %s847_s11 = smov %s663_s23  ;;  %s848_s12 = smov %s583_s13 }
  0x82   : > { %s849_s13 = smov %s851_s17  ;;  %20 = sbr.rel (!%p18_p2) target bundleno = 8 (0x8), region = 90 }
  0x89   :  { %268 = vsyncpa [#allocation3], 1 }
  0x8a   :  { %270 = vsyncpa [#allocation3 + $0x1], 1 }
  0x8b   :  { %271 = vsyncpa [#allocation6], 1 }
  0x8c   :  { %273 = vsyncpa [#allocation6 + $0x1], 1 }
  0x8d   :  { %274 = vsyncpa [#allocation4], 1 }
  0x8e   :  { %276 = vsyncpa [#allocation4 + $0x1], 1 }

</bundles_post_ra>
